<compile_context>
chip_gen: v7x
topology: tpu7x:2x2x1
jax: 0.10.0
libtpu: 0.0.40
codegen_flags: <defaults>
</compile_context>

<pallas_src>
import functools

import jax
import jax.numpy as jnp
from jax.experimental import pallas as pl
from jax.experimental.pallas import tpu as pltpu

_VMEM_LIMIT = 48 * 1024 * 1024  # explicit scoped-VMEM cap (safe on v5e/v6e/v7x)


def _round_up(x, m):
    return ((x + m - 1) // m) * m


def _pick_tile(dim, align, tmax):
    """Largest tile <= tmax that is a multiple of `align` and divides the
    `align`-rounded dim, so runtime zero-padding is at most `align-1`."""
    dp = _round_up(dim, align)
    t = min(tmax, dp)
    t -= t % align
    while dp % t != 0:
        t -= align
    return t, dp


# --------------------------------------------------------------------------
# Pallas matmul kernel (hot path: all convs via im2col, and the FC layer)
# --------------------------------------------------------------------------
def _matmul_kernel(a_ref, b_ref, o_ref):
    @pl.when(pl.program_id(2) == 0)
    def _():
        o_ref[...] = jnp.zeros_like(o_ref)

    # bf16 x bf16 -> f32 accumulation directly in the resident output block.
    o_ref[...] += jnp.dot(a_ref[...], b_ref[...],
                          preferred_element_type=jnp.float32)


def matmul_pallas(a, b, tm_max=256, tn_max=256, tk_max=512):
    """(M, K) @ (K, N) -> f32 (M, N); 3-D tiled, bf16 MXU inputs."""
    M, K = a.shape
    K2, N = b.shape
    assert K == K2
    a = a.astype(jnp.bfloat16)
    b = b.astype(jnp.bfloat16)

    tm, Mp = _pick_tile(M, 8, tm_max)
    tn, Np = _pick_tile(N, 128, tn_max)
    tk, Kp = _pick_tile(K, 128, tk_max)

    if (Mp, Kp) != (M, K):
        a = jnp.pad(a, ((0, Mp - M), (0, Kp - K)))
    if (Kp, Np) != (K, N):
        b = jnp.pad(b, ((0, Kp - K), (0, Np - N)))

    out = pl.pallas_call(
        _matmul_kernel,
        out_shape=jax.ShapeDtypeStruct((Mp, Np), jnp.float32),
        grid=(Mp // tm, Np // tn, Kp // tk),          # reduction axis last
        in_specs=[pl.BlockSpec((tm, tk), lambda i, j, k: (i, k)),
                  pl.BlockSpec((tk, tn), lambda i, j, k: (k, j))],
        out_specs=pl.BlockSpec((tm, tn), lambda i, j, k: (i, j)),
        compiler_params=pltpu.CompilerParams(
            dimension_semantics=("parallel", "parallel", "arbitrary"),
            vmem_limit_bytes=_VMEM_LIMIT),
    )(a, b)

    if (Mp, Np) != (M, N):
        out = out[:M, :N]
    return out


# --------------------------------------------------------------------------
# Pallas BatchNorm: two-pass, row-tiled.
#   pass 1: per-channel sum / sum-of-squares (resident (1,C) accumulators)
#   pass 2: normalize + gamma/beta + optional residual add + optional ReLU
# --------------------------------------------------------------------------
def _bn_stats_kernel(x_ref, sum_ref, sq_ref):
    @pl.when(pl.program_id(0) == 0)
    def _():
        sum_ref[...] = jnp.zeros_like(sum_ref)
        sq_ref[...] = jnp.zeros_like(sq_ref)

    x = x_ref[...]
    sum_ref[...] += jnp.sum(x, axis=0, keepdims=True)
    sq_ref[...] += jnp.sum(x * x, axis=0, keepdims=True)


def _bn_norm_kernel(*refs, relu, has_res, eps, m_true):
    if has_res:
        x_ref, sum_ref, sq_ref, g_ref, b_ref, res_ref, o_ref = refs
    else:
        x_ref, sum_ref, sq_ref, g_ref, b_ref, o_ref = refs
        res_ref = None

    inv_m = 1.0 / m_true
    mu = sum_ref[...] * inv_m
    var = jnp.maximum(sq_ref[...] * inv_m - mu * mu, 0.0)   # biased (training BN)
    scale = g_ref[...] * jax.lax.rsqrt(var + eps)
    shift = b_ref[...] - mu * scale
    y = x_ref[...] * scale + shift
    if has_res:
        y = y + res_ref[...]
    if relu:
        y = jnp.maximum(y, 0.0)
    o_ref[...] = y


def batchnorm_pallas(x2d, gamma, beta, residual=None, relu=False, eps=1e-5,
                     tm_max=512):
    """x2d: (rows=N*H*W, C).  Training-mode BatchNorm2d + optional add/ReLU."""
    M, C = x2d.shape
    x2d = x2d.astype(jnp.float32)
    g = gamma.reshape(1, C).astype(jnp.float32)
    b = beta.reshape(1, C).astype(jnp.float32)
    has_res = residual is not None
    if has_res:
        residual = residual.astype(jnp.float32)

    tm, Mp = _pick_tile(M, 8, tm_max)
    if Mp != M:  # zero rows: harmless for sum/sumsq (divide by true M); sliced off
        x2d = jnp.pad(x2d, ((0, Mp - M), (0, 0)))
        if has_res:
            residual = jnp.pad(residual, ((0, Mp - M), (0, 0)))
    grid = (Mp // tm,)

    # pass 1: per-channel statistics
    s, sq = pl.pallas_call(
        _bn_stats_kernel,
        out_shape=(jax.ShapeDtypeStruct((1, C), jnp.float32),
                   jax.ShapeDtypeStruct((1, C), jnp.float32)),
        grid=grid,
        in_specs=[pl.BlockSpec((tm, C), lambda i: (i, 0))],
        out_specs=(pl.BlockSpec((1, C), lambda i: (0, 0)),
                   pl.BlockSpec((1, C), lambda i: (0, 0))),
        compiler_params=pltpu.CompilerParams(
            dimension_semantics=("arbitrary",),
            vmem_limit_bytes=_VMEM_LIMIT),
    )(x2d)

    # pass 2: normalize (+ residual) (+ ReLU), row-tiled
    args = (x2d, s, sq, g, b) + ((residual,) if has_res else ())
    in_specs = [pl.BlockSpec((tm, C), lambda i: (i, 0)),
                pl.BlockSpec((1, C), lambda i: (0, 0)),
                pl.BlockSpec((1, C), lambda i: (0, 0)),
                pl.BlockSpec((1, C), lambda i: (0, 0)),
                pl.BlockSpec((1, C), lambda i: (0, 0))]
    if has_res:
        in_specs.append(pl.BlockSpec((tm, C), lambda i: (i, 0)))
    kernel = functools.partial(_bn_norm_kernel, relu=relu, has_res=has_res,
                               eps=eps, m_true=float(M))
    y = pl.pallas_call(
        kernel,
        out_shape=jax.ShapeDtypeStruct((Mp, C), jnp.float32),
        grid=grid,
        in_specs=in_specs,
        out_specs=pl.BlockSpec((tm, C), lambda i: (i, 0)),
        compiler_params=pltpu.CompilerParams(
            dimension_semantics=("parallel",),
            vmem_limit_bytes=_VMEM_LIMIT),
    )(*args)

    if Mp != M:
        y = y[:M]
    return y


# --------------------------------------------------------------------------
# Conv2d = im2col (JAX glue, bf16 patches) + Pallas matmul
# --------------------------------------------------------------------------
# TODO(synk): fuse patch extraction into the matmul kernel (sum of kh*kw
# shifted matmuls or in-kernel gather) to avoid materializing the 9x/49x
# inflated im2col matrix in HBM on large inputs.
def _im2col(x, kh, kw, stride, pad):
    # x: (N, H, W, C) -> (N*OH*OW, kh*kw*C), patch order (kh, kw, C)
    n, h, w, c = x.shape
    xp = jnp.pad(x, ((0, 0), (pad, pad), (pad, pad), (0, 0)))
    hp, wp = h + 2 * pad, w + 2 * pad
    oh = (hp - kh) // stride + 1
    ow = (wp - kw) // stride + 1
    cols = []
    for i in range(kh):
        for j in range(kw):
            cols.append(xp[:, i:i + stride * oh:stride,
                           j:j + stride * ow:stride, :])
    patches = jnp.stack(cols, axis=3)              # (N, OH, OW, kh*kw, C)
    return patches.reshape(n * oh * ow, kh * kw * c), (n, oh, ow)


def conv2d_pallas(x_nhwc, w_oihw, stride, pad):
    o, i, kh, kw = w_oihw.shape
    x_bf16 = x_nhwc.astype(jnp.bfloat16)           # halve im2col HBM traffic
    patches, (n, oh, ow) = _im2col(x_bf16, kh, kw, stride, pad)
    w2d = jnp.transpose(w_oihw, (2, 3, 1, 0)).reshape(kh * kw * i, o)
    y = matmul_pallas(patches, w2d)                # f32 output
    return y.reshape(n, oh, ow, o)


# --------------------------------------------------------------------------
# BasicBlock / ResNet forward
# --------------------------------------------------------------------------
def basic_block_forward(x, p):
    n = x.shape[0]
    stride = p['stride']
    y = conv2d_pallas(x, p['conv1'], stride=stride, pad=1)
    _, oh, ow, cout = y.shape
    y = batchnorm_pallas(y.reshape(-1, cout), p['bn1_g'], p['bn1_b'], relu=True)
    y = conv2d_pallas(y.reshape(n, oh, ow, cout), p['conv2'], stride=1, pad=1)
    if 'short_conv' in p:
        r = conv2d_pallas(x, p['short_conv'], stride=stride, pad=0)
        r = batchnorm_pallas(r.reshape(-1, cout), p['short_bn_g'],
                             p['short_bn_b'], relu=False)
    else:
        r = x.reshape(-1, cout)
    out = batchnorm_pallas(y.reshape(-1, cout), p['bn2_g'], p['bn2_b'],
                           residual=r, relu=True)
    return out.reshape(n, oh, ow, cout)


def resnet_forward(x_nchw, params):
    x = jnp.transpose(x_nchw, (0, 2, 3, 1)).astype(jnp.float32)  # NCHW -> NHWC
    y = conv2d_pallas(x, params['lead_conv'], stride=2, pad=3)
    n, h, w, c = y.shape
    y = batchnorm_pallas(y.reshape(-1, c), params['lead_bn_g'],
                         params['lead_bn_b'], relu=True).reshape(n, h, w, c)
    # NOTE: this reference module has NO maxpool after the stem.
    for blocks in params['layers']:
        for p in blocks:
            y = basic_block_forward(y, p)
    feat = jnp.mean(y, axis=(1, 2))            # AdaptiveAvgPool2d((1,1)) + view
    logits = matmul_pallas(feat, params['dense_w_t']) + params['dense_b'][None, :]
    return logits


# --------------------------------------------------------------------------
# Deterministic parameter initialization (shapes from ResNet.__init__)
# --------------------------------------------------------------------------
def _conv_init(key, o, i, kh, kw):
    fan_in = i * kh * kw
    return jax.random.normal(key, (o, i, kh, kw), jnp.float32) * (2.0 / fan_in) ** 0.5


def _init_block(key, cin, cout, stride):
    ks = jax.random.split(key, 3)
    p = {
        'conv1': _conv_init(ks[0], cout, cin, 3, 3),
        'bn1_g': jnp.ones((cout,), jnp.float32),
        'bn1_b': jnp.zeros((cout,), jnp.float32),
        'conv2': _conv_init(ks[1], cout, cout, 3, 3),
        'bn2_g': jnp.ones((cout,), jnp.float32),
        'bn2_b': jnp.zeros((cout,), jnp.float32),
        'stride': stride,
    }
    if stride != 1 or cin != cout:
        p['short_conv'] = _conv_init(ks[2], cout, cin, 1, 1)
        p['short_bn_g'] = jnp.ones((cout,), jnp.float32)
        p['short_bn_b'] = jnp.zeros((cout,), jnp.float32)
    return p


def init_resnet_params(key, num_class=10):
    keys = jax.random.split(key, 16)
    params = {
        'lead_conv': _conv_init(keys[0], 64, 3, 7, 7),
        'lead_bn_g': jnp.ones((64,), jnp.float32),
        'lead_bn_b': jnp.zeros((64,), jnp.float32),
    }
    layers = []
    cin = 64
    k_idx = 1
    for cout, stride in [(64, 1), (128, 2), (256, 2), (512, 2)]:
        blocks = [_init_block(keys[k_idx], cin, cout, stride)]
        k_idx += 1
        blocks.append(_init_block(keys[k_idx], cout, cout, 1))
        k_idx += 1
        layers.append(blocks)
        cin = cout
    params['layers'] = layers
    # Pre-transposed FC weight: stored (512, num_class) so no runtime .T pass.
    dense_w = (jax.random.normal(keys[k_idx], (num_class, 512), jnp.float32)
               * (1.0 / 512) ** 0.5)
    params['dense_w_t'] = jnp.transpose(dense_w)
    params['dense_b'] = jnp.zeros((num_class,), jnp.float32)
    return params


# --------------------------------------------------------------------------
if __name__ == "__main__":
    key = jax.random.PRNGKey(0)
    pkey, xkey = jax.random.split(key)
    params = init_resnet_params(pkey, num_class=10)
    x = jax.random.normal(xkey, (2, 3, 16, 16), jnp.float32)  # NCHW, like PyTorch
    logits = resnet_forward(x, params)
    jax.block_until_ready(logits)
    assert logits.shape == (2, 10)
    assert bool(jnp.all(jnp.isfinite(logits)))
    print("KERNEL_OK")
</pallas_src>

<mosaic_0001>
module attributes {stable_mosaic.version = 11 : i64} {
  func.func @_matmul_kernel(%arg0: i32, %arg1: i32, %arg2: i32, %arg3: memref<128x256xbf16, #tpu.memory_space<vmem>>, %arg4: memref<256x128xbf16, #tpu.memory_space<vmem>>, %arg5: memref<128x128xf32, #tpu.memory_space<vmem>>) attributes {dimension_semantics = [#tpu.dimension_semantics<parallel>, #tpu.dimension_semantics<parallel>, #tpu.dimension_semantics<arbitrary>], iteration_bounds = array<i64: 1, 1, 1>, scalar_prefetch = 0 : i64, scratch_operands = 0 : i64, tpu.core_type = #tpu.core_type<tc>, window_params = [{transform_indices = @transform_0, window_bounds = array<i64: 128, 256>}, {transform_indices = @transform_1, window_bounds = array<i64: 256, 128>}, {transform_indices = @transform_2, window_bounds = array<i64: 128, 128>}]} {
    %c0_i32 = arith.constant 0 : i32
    %0 = arith.cmpi eq, %arg2, %c0_i32 : i32
    %1 = arith.extui %0 : i1 to i32
    %c0_i32_0 = arith.constant 0 : i32
    %2 = arith.cmpi ne, %1, %c0_i32_0 : i32
    scf.if %2 {
      %cst_8 = arith.constant 0.000000e+00 : f32
      %9 = vector.broadcast %cst_8 : f32 to vector<128x128xf32>
      %c0_9 = arith.constant 0 : index
      %c0_10 = arith.constant 0 : index
      %10 = vector.load %arg5[%c0_9, %c0_10] : memref<128x128xf32, #tpu.memory_space<vmem>>, vector<128x128xf32>
      tpu.vector_store %arg5[%c0_9, %c0_10], %9 {strides = array<i32>} : memref<128x128xf32, #tpu.memory_space<vmem>>, vector<128x128xf32>,
    } else {
    }
    %c0 = arith.constant 0 : index
    %c0_1 = arith.constant 0 : index
    %3 = vector.load %arg5[%c0, %c0_1] : memref<128x128xf32, #tpu.memory_space<vmem>>, vector<128x128xf32>
    %c0_2 = arith.constant 0 : index
    %c0_3 = arith.constant 0 : index
    %4 = vector.load %arg3[%c0_2, %c0_3] : memref<128x256xbf16, #tpu.memory_space<vmem>>, vector<128x256xbf16>
    %c0_4 = arith.constant 0 : index
    %c0_5 = arith.constant 0 : index
    %5 = vector.load %arg4[%c0_4, %c0_5] : memref<256x128xbf16, #tpu.memory_space<vmem>>, vector<256x128xbf16>
    %cst = arith.constant dense<0.000000e+00> : vector<128x128xf32>
    %6 = tpu.matmul %4, %5, %cst {dimension_numbers = #tpu.dot_dimension_numbers<[1], [0], [0], [1], [0, 0, 1, 1], [], []>} : vector<128x256xbf16>, vector<256x128xbf16>, vector<128x128xf32> -> vector<128x128xf32>
    %7 = arith.addf %3, %6 : vector<128x128xf32>
    %c0_6 = arith.constant 0 : index
    %c0_7 = arith.constant 0 : index
    %8 = vector.load %arg5[%c0_6, %c0_7] : memref<128x128xf32, #tpu.memory_space<vmem>>, vector<128x128xf32>
    tpu.vector_store %arg5[%c0_6, %c0_7], %7 {strides = array<i32>} : memref<128x128xf32, #tpu.memory_space<vmem>>, vector<128x128xf32>,
    return
  }
  func.func @transform_0(%arg0: i32, %arg1: i32, %arg2: i32) -> (i32, i32) {
    %c0_i32 = arith.constant 0 : i32
    return %arg0, %arg2 : i32, i32
  }
  func.func @transform_1(%arg0: i32, %arg1: i32, %arg2: i32) -> (i32, i32) {
    %c0_i32 = arith.constant 0 : i32
    return %arg2, %arg1 : i32, i32
  }
  func.func @transform_2(%arg0: i32, %arg1: i32, %arg2: i32) -> (i32, i32) {
    %c0_i32 = arith.constant 0 : i32
    return %arg0, %arg1 : i32, i32
  }
}

</mosaic_0001>

<bundles_post_ra>
// kernel: tpu_custom_call.1
= control target key start
LH: loop header
LB: loop body
LE: loop exit
PB: predicated region body
PF: predicated region fallthrough
CT: control target
= control target key end

     0   :  { %7 = vsyncpa [#allocation3], 0  ;;  %s744_s0 = inlined_call_operand.hbm [shape: bf16[128,256], index: 0, kind: input, shape index: {}]   ;;  %s745_s1 = inlined_call_operand.hbm [shape: bf16[256,128], index: 1, kind: input, shape index: {}]   ;;  %s746_s2 = inlined_call_operand.hbm [shape: f32[128,128], index: 2, kind: output, shape index: {}]  }
   0x1   :  { %8 = vsyncpa [#allocation6], 0 }
   0x2   :  { %9 = vsyncpa [#allocation4], 0  ;;  %s680_s9 = smov [#allocation2]   ;;  %s608_s13 = scalar_lea.hbm %s744_s0, 2048 }
   0x3   :  { %s15_s10 = sshll.u32 %s680_s9, 4  ;;  %p609_p0 = scmp.ne.s32.totalorder %s744_s0, %s608_s13  ;;  %s16_s10 = int_to_ptr.vmem [resolvable:$true] %s15_s10 }
   0x4   :  { %p612_p1 = scmp.lt.u32.totalorder %s608_s13, %s744_s0 }
   0x6   :  { %p614_p2 = pnand %p612_p1, %p609_p0 }
   0x8   :  { %617 = shalt.err (!%p614_p2)
}
   0x9   :  { %s618_s18 = scalar_lea.vmem %s16_s10, 2048  ;;  %p623_p4 = scmp.lt.s32.totalorder %s16_s10, %s16_s10 }
   0xa   :  { %p619_p3 = scmp.ne.s32.totalorder %s16_s10, %s618_s18  ;;  %p624_p5 = scmp.lt.s32.totalorder %s618_s18, %s618_s18 }
   0xc   :  { %p625_p6 = por %p624_p5, %p623_p4 }
   0xe   :  { %p626_p7 = pnand %p625_p6, %p619_p3 }
  0x10   :  { %629 = shalt.err (!%p626_p7)
}
  0x11   :  { %s681_s19 = smov 128   ;;  %s682_s20 = smov 8  }
  0x12   :  { %21 = dma.hbm_to_vmem [thread:$0]  %s744_s0, 2048, %s16_s10, [#allocation3], %s681_s19, %s681_s19, %s682_s20  }
  0x13   :  { %s683_s23 = smov [#allocation5]   ;;  %s630_s27 = scalar_lea.hbm %s745_s1, 2048 }
  0x14   :  { %s27_s24 = sshll.u32 %s683_s23, 4  ;;  %p631_p8 = scmp.ne.s32.totalorder %s745_s1, %s630_s27  ;;  %s28_s24 = int_to_ptr.vmem [resolvable:$true] %s27_s24 }
  0x15   :  { %p634_p9 = scmp.lt.u32.totalorder %s630_s27, %s745_s1 }
  0x17   :  { %p636_p10 = pnand %p634_p9, %p631_p8 }
  0x19   :  { %639 = shalt.err (!%p636_p10)
}
  0x1a   :  { %s640_s4 = scalar_lea.vmem %s28_s24, 2048  ;;  %p645_p12 = scmp.lt.s32.totalorder %s28_s24, %s28_s24 }
  0x1b   :  { %p641_p11 = scmp.ne.s32.totalorder %s28_s24, %s640_s4  ;;  %p646_p13 = scmp.lt.s32.totalorder %s640_s4, %s640_s4 }
  0x1d   :  { %p647_p0 = por %p646_p13, %p645_p12 }
  0x1f   :  { %p648_p1 = pnand %p647_p0, %p641_p11 }
  0x21   :  { %651 = shalt.err (!%p648_p1)
}
  0x22   :  { %s684_s0 = smov 64   ;;  %s685_s5 = smov 4  }
  0x23   :  { %33 = dma.hbm_to_vmem [thread:$0]  %s745_s1, 2048, %s28_s24, [#allocation6], %s684_s0, %s684_s0, %s685_s5  }
  0x24   :  { %674 = dma.done.wait [#allocation3], 2048  }
  0x25   :  { %675 = vsyncadd [#allocation3], 4294965248 }
  0x26   :  { %676 = dma.done.wait [#allocation6], 2048  }
  0x27   :  { %677 = vsyncadd [#allocation6], 4294965248  ;;  %v568_v0 = vld [vmem:[#allocation5 + $0x40] sm:$0xff]   ;;  %v570_v2 = vld [vmem:[#allocation5 + $0x48] sm:$0xff]   ;;  %s686_s1 = smov [#allocation7]  }
  0x28   :  { %v569_v1 = vld [vmem:[#allocation5] sm:$0xff]   ;;  %480 = vmatprep.subr.bf16.mxu0 %v568_v0  ;;  %544 = vmatprep.subr.bf16.mxu1 %v568_v0  ;;  %v571_v3 = vld [vmem:[#allocation5 + $0x8] sm:$0xff]   ;;  %v572_v4 = vld [vmem:[#allocation5 + $0x50] sm:$0xff]   ;;  %s435_s8 = sshll.u32 %s686_s1, 4  ;;  %s436_s8 = int_to_ptr.vmem [resolvable:$true] %s435_s8 }
  0x29   :  { %481 = vmatpush3.bf16.msra.mxu0 %v569_v1  ;;  %552 = vmatpush3.bf16.msra.mxu1 %v569_v1  ;;  %v573_v5 = vld [vmem:[#allocation5 + $0x10] sm:$0xff]   ;;  %v574_v6 = vld [vmem:[#allocation5 + $0x58] sm:$0xff]   ;;  %v576_v8 = vld [vmem:[#allocation5 + $0x60] sm:$0xff]   ;;  %s652_s9 = scalar_lea.vmem %s436_s8, 2048  ;;  %p657_p3 = scmp.lt.s32.totalorder %s436_s8, %s436_s8 }
  0x2a   :  { %482 = vmatprep.subr.bf16.mxu0 %v570_v2  ;;  %545 = vmatprep.subr.bf16.mxu1 %v570_v2  ;;  %v575_v7 = vld [vmem:[#allocation5 + $0x18] sm:$0xff]   ;;  %v577_v9 = vld [vmem:[#allocation5 + $0x20] sm:$0xff]   ;;  %v578_v10 = vld [vmem:[#allocation5 + $0x68] sm:$0xff]   ;;  %p653_p2 = scmp.ne.s32.totalorder %s436_s8, %s652_s9  ;;  %p658_p4 = scmp.lt.s32.totalorder %s652_s9, %s652_s9 }
  0x2b   :  { %v586_v11 = vld [vmem:[#allocation2 + $0x4] ss:$8 sps:$4 sm:$0xff]   ;;  %v580_v14 = vld [vmem:[#allocation5 + $0x70] sm:$0xff]   ;;  %v582_v16 = vld [vmem:[#allocation5 + $0x78] sm:$0xff]  }
  0x2c   :  { %v589_v12 = vld [vmem:[#allocation2 + $0x44] ss:$8 sps:$4 sm:$0xff]   ;;  %333 = vmatprep.mubr.bf16.mxu0 %v586_v11  ;;  %v581_v15 = vld [vmem:[#allocation5 + $0x30] sm:$0xff]   ;;  %v583_v17 = vld [vmem:[#allocation5 + $0x38] sm:$0xff]   ;;  %p659_p5 = por %p658_p4, %p657_p3 }
  0x2d   :  { %483 = vmatpush3.bf16.msra.mxu0 %v571_v3  ;;  %553 = vmatpush3.bf16.msra.mxu1 %v571_v3  ;;  %v579_v13 = vld [vmem:[#allocation5 + $0x28] sm:$0xff]   ;;  %v590_v20 = vld [vmem:[#allocation2 + $0x14] ss:$8 sps:$4 sm:$0xff]   ;;  %v594_v22 = vld [vmem:[#allocation2 + $0x10] ss:$8 sps:$4 sm:$0xff]  }
  0x2e   :  { %484 = vmatprep.subr.bf16.mxu0 %v572_v4  ;;  %546 = vmatprep.subr.bf16.mxu1 %v572_v4  ;;  %v584_v18 = vld [vmem:[#allocation2] ss:$8 sps:$4 sm:$0xff]   ;;  %v592_v21 = vld [vmem:[#allocation2 + $0x54] ss:$8 sps:$4 sm:$0xff]   ;;  %v595_v23 = vld [vmem:[#allocation2 + $0x50] ss:$8 sps:$4 sm:$0xff]   ;;  %p660_p6 = pnand %p659_p5, %p653_p2 }
  0x2f   :  { %365 = vmatprep.mubr.bf16.mxu1 %v589_v12  ;;  %v587_v19 = vld [vmem:[#allocation2 + $0x40] ss:$8 sps:$4 sm:$0xff]   ;;  %v596_v24 = vld [vmem:[#allocation2 + $0x24] ss:$8 sps:$4 sm:$0xff]   ;;  %v602_v28 = vld [vmem:[#allocation2 + $0x34] ss:$8 sps:$4 sm:$0xff]  }
  0x30   :  { %v598_v25 = vld [vmem:[#allocation2 + $0x64] ss:$8 sps:$4 sm:$0xff]   ;;  %v600_v26 = vld [vmem:[#allocation2 + $0x20] ss:$8 sps:$4 sm:$0xff]   ;;  %v604_v29 = vld [vmem:[#allocation2 + $0x74] ss:$8 sps:$4 sm:$0xff]  }
  0x31   :  { %485 = vmatpush3.bf16.msra.mxu0 %v573_v5  ;;  %554 = vmatpush3.bf16.msra.mxu1 %v573_v5  ;;  %v601_v27 = vld [vmem:[#allocation2 + $0x60] ss:$8 sps:$4 sm:$0xff]   ;;  %v606_v30 = vld [vmem:[#allocation2 + $0x30] ss:$8 sps:$4 sm:$0xff]  }
  0x32   :  { %486 = vmatprep.subr.bf16.mxu0 %v574_v6  ;;  %547 = vmatprep.subr.bf16.mxu1 %v574_v6  ;;  %v607_v31 = vld [vmem:[#allocation2 + $0x70] ss:$8 sps:$4 sm:$0xff]  }
  0x35   :  { %487 = vmatpush3.bf16.msra.mxu0 %v575_v7  ;;  %555 = vmatpush3.bf16.msra.mxu1 %v575_v7 }
  0x36   :  { %488 = vmatprep.subr.bf16.mxu0 %v576_v8  ;;  %548 = vmatprep.subr.bf16.mxu1 %v576_v8 }
  0x39   :  { %489 = vmatpush3.bf16.msra.mxu0 %v577_v9  ;;  %556 = vmatpush3.bf16.msra.mxu1 %v577_v9 }
  0x3a   :  { %490 = vmatprep.subr.bf16.mxu0 %v578_v10  ;;  %549 = vmatprep.subr.bf16.mxu1 %v578_v10 }
  0x3d   :  { %491 = vmatpush3.bf16.msra.mxu0 %v579_v13  ;;  %557 = vmatpush3.bf16.msra.mxu1 %v579_v13 }
  0x3e   :  { %492 = vmatprep.subr.bf16.mxu0 %v580_v14  ;;  %550 = vmatprep.subr.bf16.mxu1 %v580_v14 }
  0x41   :  { %493 = vmatpush3.bf16.msra.mxu0 %v581_v15  ;;  %558 = vmatpush3.bf16.msra.mxu1 %v581_v15 }
  0x42   :  { %494 = vmatprep.subr.bf16.mxu0 %v582_v16  ;;  %551 = vmatprep.subr.bf16.mxu1 %v582_v16 }
  0x45   :  { %495 = vmatpush3.bf16.msra.mxu0 %v583_v17  ;;  %559 = vmatpush3.bf16.msra.mxu1 %v583_v17 }
  0x48   :  { %334 = vmatmul.mubr.bf16.vlgmr.msra.gmra.mrb[0].mxu0 %v584_v18  ;;  %366 = vmatmul.mubr.bf16.vlgmr.msra.gmra.mrb[0].mxu1 %v587_v19 }
  0x49   :  { %341 = vmatprep.mubr.bf16.mxu0 %v590_v20  ;;  %373 = vmatprep.mubr.bf16.mxu1 %v592_v21 }
  0x50   :  { %342 = vmatmul.mubr.bf16.gmra.mrb[4].mxu0 %v594_v22  ;;  %374 = vmatmul.mubr.bf16.gmra.mrb[4].mxu1 %v595_v23 }
  0x51   :  { %349 = vmatprep.mubr.bf16.mxu0 %v596_v24  ;;  %381 = vmatprep.mubr.bf16.mxu1 %v598_v25 }
  0x58   :  { %350 = vmatmul.mubr.bf16.gmra.mrb[8].mxu0 %v600_v26  ;;  %382 = vmatmul.mubr.bf16.gmra.mrb[8].mxu1 %v601_v27 }
  0x59   :  { %357 = vmatprep.mubr.bf16.mxu0 %v602_v28  ;;  %389 = vmatprep.mubr.bf16.mxu1 %v604_v29 }
  0x60   :  { %358 = vmatmul.mubr.bf16.gmra.mrb[12].mxu0 %v606_v30  ;;  %390 = vmatmul.mubr.bf16.gmra.mrb[12].mxu1 %v607_v31 }
 0x11b   :  { %v496_v32 = vpop.f32.mrb[0].mxu0  ;;  %v520_v33 = vpop.f32.mrb[0].mxu1 }
 0x11c   :  { %v497_v34 = vpop.f32.mrb[1].mxu0  ;;  %v521_v35 = vpop.f32.mrb[1].mxu1 }
 0x11d   :  { %v498_v36 = vadd.f32 %v497_v34, %v496_v32  ;;  %v522_v37 = vadd.f32 %v521_v35, %v520_v33  ;;  %v499_v38 = vpop.f32.mrb[2].mxu0  ;;  %v523_v39 = vpop.f32.mrb[2].mxu1 }
 0x11e   :  { %v500_v40 = vpop.f32.mrb[3].mxu0  ;;  %v524_v41 = vpop.f32.mrb[3].mxu1 }
 0x11f   :  { %v501_v42 = vadd.f32 %v500_v40, %v499_v38  ;;  %v525_v43 = vadd.f32 %v524_v41, %v523_v39  ;;  %414 = vst [vmem:[#allocation7] sm:$0xff] %v498_v36  ;;  %422 = vst [vmem:[#allocation7 + $0x40] sm:$0xff] %v522_v37 }
 0x121   :  { %415 = vst [vmem:[#allocation7 + $0x8] sm:$0xff] %v501_v42  ;;  %423 = vst [vmem:[#allocation7 + $0x48] sm:$0xff] %v525_v43 }
 0x123   :  { %v502_v44 = vpop.f32.mrb[4].mxu0  ;;  %v526_v45 = vpop.f32.mrb[4].mxu1 }
 0x124   :  { %v503_v46 = vpop.f32.mrb[5].mxu0  ;;  %v527_v47 = vpop.f32.mrb[5].mxu1 }
 0x125   :  { %v504_v48 = vadd.f32 %v503_v46, %v502_v44  ;;  %v528_v49 = vadd.f32 %v527_v47, %v526_v45  ;;  %v505_v50 = vpop.f32.mrb[6].mxu0  ;;  %v529_v51 = vpop.f32.mrb[6].mxu1 }
 0x126   :  { %v506_v52 = vpop.f32.mrb[7].mxu0  ;;  %v530_v53 = vpop.f32.mrb[7].mxu1 }
 0x127   :  { %v507_v54 = vadd.f32 %v506_v52, %v505_v50  ;;  %v531_v55 = vadd.f32 %v530_v53, %v529_v51  ;;  %416 = vst [vmem:[#allocation7 + $0x10] sm:$0xff] %v504_v48  ;;  %424 = vst [vmem:[#allocation7 + $0x50] sm:$0xff] %v528_v49 }
 0x129   :  { %417 = vst [vmem:[#allocation7 + $0x18] sm:$0xff] %v507_v54  ;;  %425 = vst [vmem:[#allocation7 + $0x58] sm:$0xff] %v531_v55 }
 0x12b   :  { %v508_v56 = vpop.f32.mrb[8].mxu0  ;;  %v532_v57 = vpop.f32.mrb[8].mxu1 }
 0x12c   :  { %v509_v58 = vpop.f32.mrb[9].mxu0  ;;  %v533_v59 = vpop.f32.mrb[9].mxu1 }
 0x12d   :  { %v510_v60 = vadd.f32 %v509_v58, %v508_v56  ;;  %v534_v61 = vadd.f32 %v533_v59, %v532_v57  ;;  %v511_v62 = vpop.f32.mrb[10].mxu0  ;;  %v535_v63 = vpop.f32.mrb[10].mxu1 }
 0x12e   :  { %v512_v0 = vpop.f32.mrb[11].mxu0  ;;  %v536_v1 = vpop.f32.mrb[11].mxu1 }
 0x12f   :  { %v513_v2 = vadd.f32 %v512_v0, %v511_v62  ;;  %v537_v3 = vadd.f32 %v536_v1, %v535_v63  ;;  %418 = vst [vmem:[#allocation7 + $0x20] sm:$0xff] %v510_v60  ;;  %426 = vst [vmem:[#allocation7 + $0x60] sm:$0xff] %v534_v61 }
 0x131   :  { %419 = vst [vmem:[#allocation7 + $0x28] sm:$0xff] %v513_v2  ;;  %427 = vst [vmem:[#allocation7 + $0x68] sm:$0xff] %v537_v3 }
 0x133   :  { %v514_v4 = vpop.f32.mrb[12].mxu0  ;;  %v538_v5 = vpop.f32.mrb[12].mxu1 }
 0x134   :  { %v515_v6 = vpop.f32.mrb[13].mxu0  ;;  %v539_v7 = vpop.f32.mrb[13].mxu1 }
 0x135   :  { %v516_v8 = vadd.f32 %v515_v6, %v514_v4  ;;  %v540_v9 = vadd.f32 %v539_v7, %v538_v5  ;;  %v517_v10 = vpop.f32.mrb[14].mxu0  ;;  %v541_v11 = vpop.f32.mrb[14].mxu1 }
 0x136   :  { %v518_v12 = vpop.f32.mrb[15].mxu0  ;;  %v542_v13 = vpop.f32.mrb[15].mxu1 }
 0x137   :  { %v519_v14 = vadd.f32 %v518_v12, %v517_v10  ;;  %v543_v15 = vadd.f32 %v542_v13, %v541_v11  ;;  %420 = vst [vmem:[#allocation7 + $0x30] sm:$0xff] %v516_v8  ;;  %428 = vst [vmem:[#allocation7 + $0x70] sm:$0xff] %v540_v9 }
 0x139   :  { %421 = vst [vmem:[#allocation7 + $0x38] sm:$0xff] %v519_v14  ;;  %429 = vst [vmem:[#allocation7 + $0x78] sm:$0xff] %v543_v15 }
 0x13a   :  { %663 = shalt.err (!%p660_p6)
}
 0x13b   :  { %s664_s12 = scalar_lea.hbm %s746_s2, 2048 }
 0x13c   :  { %p665_p7 = scmp.ne.s32.totalorder %s746_s2, %s664_s12  ;;  %p668_p8 = scmp.lt.u32.totalorder %s664_s12, %s746_s2 }
 0x13e   :  { %p670_p9 = pnand %p668_p8, %p665_p7 }
 0x140   :  { %673 = shalt.err (!%p670_p9)
}
 0x141   :  { %441 = dma.vmem_to_hbm [thread:$0]  %s436_s8, 2048, %s746_s2, [#allocation4], %s681_s19, %s681_s19, %s682_s20  }
 0x142   :  { %678 = dma.done.wait [#allocation4], 2048  }
 0x143   :  { %679 = vsyncadd [#allocation4], 4294965248 }
 0x144   :  { %445 = vsyncpa [#allocation3], 1 }
 0x145   :  { %446 = vsyncpa [#allocation6], 1 }
 0x146   :  { %447 = vsyncpa [#allocation4], 1 }

</bundles_post_ra>
